<compile_context>
chip_gen: v6e
topology: v6e:2x2x1
jax: 0.10.0
libtpu: 0.0.40
codegen_flags: <defaults>
</compile_context>

<pallas_src>
from functools import partial

import jax
import jax.numpy as jnp
from jax.experimental import pallas as pl
from jax.experimental.pallas import tpu as pltpu


def _round_up(v, m):
    return ((v + m - 1) // m) * m


def _sublane_tile(dtype):
    itemsize = jnp.dtype(dtype).itemsize
    return {4: 8, 2: 16, 1: 32}.get(itemsize, 8)


def _choose_pack(rows, hw):
    """Pack k consecutive rows into one lane-row so vreg lanes stay dense."""
    if hw % 128 == 0:
        return 1
    best_k, best_util = 1, hw / _round_up(hw, 128)
    for k in range(1, 33):
        if rows % k != 0:
            continue
        lanes = k * hw
        if lanes > 4096:
            break
        util = lanes / _round_up(lanes, 128)
        if util > best_util + 1e-9:
            best_k, best_util = k, util
        if util >= 0.999:
            break
    return best_k


def _vmem_limit_bytes():
    try:
        kind = jax.devices()[0].device_kind.lower()
        if "v5" in kind or "v6" in kind:
            return 64 * 1024 * 1024   # 128 MiB physical VMEM -> plenty of headroom
    except Exception:
        pass
    return 32 * 1024 * 1024           # safe everywhere (v7x: 64 MiB physical per TC)


def gem_kernel(p_ref, x_ref, o_ref, *, hw, k, eps, p_int):
    # p_ref: (1,) f32 scalar in SMEM
    # x_ref: (r_blk, k*hw) packed row tile in VMEM
    # o_ref: (r_blk, k) f32 per-row means of clamp(x, eps)^p
    x = x_ref[...].astype(jnp.float32)           # f32 math regardless of input dtype
    xc = jnp.maximum(x, eps)                     # clamp(min=eps) -> strictly positive

    if p_int is not None:
        # Integer exponent: pure VPU multiplies, no EUP work.
        xp = xc
        for _ in range(p_int - 1):
            xp = xp * xc
    else:
        # General p: x^p = exp(p*log(x)); valid because xc >= eps > 0.
        p = p_ref[0]
        xp = jnp.exp(p * jnp.log(xc))

    if k == 1:
        s = jnp.sum(xp, axis=-1, keepdims=True)                       # (r_blk, 1)
    else:
        # Segment-sum each hw-chunk of the packed lane-row on the idle MXU.
        j = jax.lax.broadcasted_iota(jnp.int32, (k * hw, k), 0)
        c = jax.lax.broadcasted_iota(jnp.int32, (k * hw, k), 1)
        seg = jnp.where(j // hw == c, 1.0, 0.0).astype(jnp.float32)   # (k*hw, k)
        s = jnp.dot(xp, seg, preferred_element_type=jnp.float32)      # (r_blk, k)

    o_ref[...] = (s * (1.0 / hw)).astype(o_ref.dtype)


def gem(x, p, eps=1e-6):
    """x: (N, C, H, W); p: scalar or (1,) float.  Returns (N, C, 1, 1)."""
    N, C, H, W = x.shape
    rows, hw = N * C, H * W
    itemsize = jnp.dtype(x.dtype).itemsize

    # Normalize p to a (1,) f32 array; detect a concrete small-integer exponent.
    p_arr = jnp.reshape(jnp.asarray(p, dtype=jnp.float32), (1,))
    p_int = None
    try:
        p_val = float(p_arr[0])
        if abs(p_val - round(p_val)) < 1e-6 and 1 <= round(p_val) <= 4:
            p_int = int(round(p_val))
    except Exception:          # traced p -> general exp(p*log(x)) path
        p_int = None

    # ---- lane packing (keep vreg lanes dense when hw % 128 != 0) -----------
    k = _choose_pack(rows, hw)
    packed_rows = rows // k
    lane_dim = k * hw
    lane_pad = _round_up(lane_dim, 128)
    row_f32 = lane_pad * 4                 # per packed row of in-kernel f32 working set

    # ---- row-block selection ------------------------------------------------
    vmem_limit = _vmem_limit_bytes()
    tile_budget = 8 * 1024 * 1024 if vmem_limit > 32 * 1024 * 1024 else 4 * 1024 * 1024
    S = _sublane_tile(x.dtype)             # 8 (f32) / 16 (bf16) / 32 (int8/fp8)

    budget_rows = max(S, (tile_budget // row_f32) // S * S)
    # Keep >= 4 grid steps when rows allow (v7x: 2 TCs x 2 pipeline buffers),
    # but never shrink a tile below ~1 MiB of f32 working set.
    quarter = ((packed_rows // 4) // S) * S
    if quarter >= S and quarter * row_f32 >= (1 << 20):
        budget_rows = min(budget_rows, quarter)

    x2 = x.reshape(packed_rows, lane_dim)  # free reshape: rows are contiguous in HBM
    pad_packed = packed_rows

    if packed_rows % S == 0:
        # Pick the largest row block that exactly divides the row count: no padding,
        # no extra HBM pass.
        target = min(budget_rows, packed_rows)
        r_blk = S
        for cand in range(target, S - 1, -S):
            if packed_rows % cand == 0:
                r_blk = cand
                break
    elif packed_rows * row_f32 <= tile_budget:
        # Small awkward row count: single full-array block (exempt from 8x128 rule).
        r_blk = packed_rows
    else:
        # Rare fallback: pad a handful of packed rows so the sublane tile divides.
        pad_packed = _round_up(packed_rows, S)
        x2 = jnp.pad(x2, ((0, pad_packed - packed_rows), (0, 0)), constant_values=1.0)
        target = min(budget_rows, pad_packed)
        r_blk = S
        for cand in range(target, S - 1, -S):
            if pad_packed % cand == 0:
                r_blk = cand
                break

    grid = pad_packed // r_blk

    cost = pl.CostEstimate(
        flops=4 * rows * hw,
        transcendentals=0 if p_int is not None else 2 * rows * hw,
        bytes_accessed=rows * hw * itemsize + rows * 4,
    )

    out = pl.pallas_call(
        partial(gem_kernel, hw=hw, k=k, eps=eps, p_int=p_int),
        out_shape=jax.ShapeDtypeStruct((pad_packed, k), jnp.float32),
        grid=(grid,),
        in_specs=[
            pl.BlockSpec(memory_space=pltpu.SMEM),                 # p (scalar)
            pl.BlockSpec((r_blk, lane_dim), lambda i: (i, 0)),     # packed row tile
        ],
        out_specs=pl.BlockSpec((r_blk, k), lambda i: (i, 0)),
        compiler_params=pltpu.CompilerParams(
            dimension_semantics=("parallel",),                     # both v7x TCs
            vmem_limit_bytes=vmem_limit,
        ),
        cost_estimate=cost,
    )(p_arr, x2)

    # Final ^(1/p) acts on only N*C values -> done in the wrapper (negligible).
    m = out.reshape(-1)[:rows]
    y = jnp.power(m, 1.0 / p_arr[0]).astype(x.dtype)
    return y.reshape(N, C, 1, 1)


if __name__ == "__main__":
    eps = 1e-6

    def ref_gem(x, p, eps):
        xp = jnp.power(jnp.maximum(x, eps), p[0])
        return jnp.power(jnp.mean(xp, axis=(-2, -1), keepdims=True), 1.0 / p[0])

    # Case 1: H*W multiple of 128 (dense lanes, k=1) + integer-p VPU fast path (p=3).
    x1 = jax.random.normal(jax.random.PRNGKey(0), (2, 4, 16, 16), dtype=jnp.float32)
    p1 = jnp.ones((1,), dtype=jnp.float32) * 3.0     # GeM.__init__ default p=3
    y1 = gem(x1, p1, eps=eps)
    jax.block_until_ready(y1)
    assert y1.shape == (2, 4, 1, 1)
    assert jnp.allclose(y1, ref_gem(x1, p1, eps), rtol=1e-4, atol=1e-5)

    # Case 2: H*W = 49 (lane-packed path, k > 1) + non-integer p (EUP exp/log path).
    x2 = jax.random.normal(jax.random.PRNGKey(1), (2, 64, 7, 7), dtype=jnp.float32)
    p2 = jnp.ones((1,), dtype=jnp.float32) * 2.5
    y2 = gem(x2, p2, eps=eps)
    jax.block_until_ready(y2)
    assert y2.shape == (2, 64, 1, 1)
    assert jnp.allclose(y2, ref_gem(x2, p2, eps), rtol=1e-4, atol=1e-5)

    print("KERNEL_OK")
</pallas_src>

<mosaic_0001>
module attributes {stable_mosaic.version = 11 : i64} {
  func.func @gem_kernel(%arg0: i32, %arg1: memref<1xf32, #tpu.memory_space<smem>>, %arg2: memref<8x256xf32, #tpu.memory_space<vmem>>, %arg3: memref<8x1xf32, #tpu.memory_space<vmem>>) attributes {dimension_semantics = [#tpu.dimension_semantics<parallel>], iteration_bounds = array<i64: 1>, scalar_prefetch = 0 : i64, scratch_operands = 0 : i64, tpu.core_type = #tpu.core_type<tc>, window_params = [{transform_indices = @transform_0, window_bounds = array<i64: 1>}, {transform_indices = @transform_1, window_bounds = array<i64: 8, 256>}, {transform_indices = @transform_2, window_bounds = array<i64: 8, 1>}]} {
    %c0 = arith.constant 0 : index
    %c0_0 = arith.constant 0 : index
    %0 = vector.load %arg2[%c0, %c0_0] : memref<8x256xf32, #tpu.memory_space<vmem>>, vector<8x256xf32>
    %cst = arith.constant 9.99999997E-7 : f32
    %1 = vector.broadcast %cst : f32 to vector<8x256xf32>
    %2 = arith.maximumf %0, %1 : vector<8x256xf32>
    %3 = arith.mulf %2, %2 : vector<8x256xf32>
    %4 = arith.mulf %3, %2 : vector<8x256xf32>
    %cst_1 = arith.constant dense<0.000000e+00> : vector<8xf32>
    %5 = vector.multi_reduction <add>, %4, %cst_1 [1] : vector<8x256xf32> to vector<8xf32>
    %6 = vector.shape_cast %5 : vector<8xf32> to vector<8x1xf32>
    %cst_2 = arith.constant 3.906250e-03 : f32
    %7 = vector.broadcast %cst_2 : f32 to vector<8x1xf32>
    %8 = arith.mulf %6, %7 : vector<8x1xf32>
    %c0_3 = arith.constant 0 : index
    %c0_4 = arith.constant 0 : index
    %9 = vector.load %arg3[%c0_3, %c0_4] : memref<8x1xf32, #tpu.memory_space<vmem>>, vector<8x1xf32>
    tpu.vector_store %arg3[%c0_3, %c0_4], %8 {strides = array<i32>} : memref<8x1xf32, #tpu.memory_space<vmem>>, vector<8x1xf32>,
    return
  }
  func.func @transform_0(%arg0: i32) -> i32 {
    %c0_i32 = arith.constant 0 : i32
    %c0_i32_0 = arith.constant 0 : i32
    return %c0_i32 : i32
  }
  func.func @transform_1(%arg0: i32) -> (i32, i32) {
    %c0_i32 = arith.constant 0 : i32
    %c0_i32_0 = arith.constant 0 : i32
    return %arg0, %c0_i32 : i32, i32
  }
  func.func @transform_2(%arg0: i32) -> (i32, i32) {
    %c0_i32 = arith.constant 0 : i32
    %c0_i32_0 = arith.constant 0 : i32
    return %arg0, %c0_i32 : i32, i32
  }
}

</mosaic_0001>

<bundles_post_ra>
// kernel: tpu_custom_call.1
= control target key start
LH: loop header
LB: loop body
LE: loop exit
PB: predicated region body
PF: predicated region fallthrough
CT: control target
= control target key end

     0   :  { %8 = vsyncpa [#allocation4], 0  ;;  %s66_s9 = smov [#allocation3]   ;;  %s88_s0 = inlined_call_operand.<no memory space> [shape: f32[1], index: 0, kind: input, shape index: {}]   ;;  %s89_s1 = inlined_call_operand.hbm [shape: f32[8,256], index: 1, kind: input, shape index: {}]   ;;  %s90_s2 = inlined_call_operand.vmem [shape: f32[8,1], index: 2, kind: output, shape index: {}]  }
   0x1   :  { %s17_s10 = sshll.u32 %s66_s9, 4  ;;  %s18_s10 = int_to_ptr.vmem [resolvable:$true] %s17_s10 }
   0x2   :  { %s52_s11 = scalar_lea.vmem %s18_s10, 256  ;;  %p57_p1 = scmp.lt.s32.totalorder %s18_s10, %s18_s10 }
   0x3   :  { %p53_p0 = scmp.ne.s32.totalorder %s18_s10, %s52_s11  ;;  %p58_p2 = scmp.lt.s32.totalorder %s52_s11, %s52_s11 }
   0x5   :  { %p59_p3 = por %p58_p2, %p57_p1 }
   0x7   :  { %p60_p4 = pnand %p59_p3, %p53_p0 }
   0x9   :  { %63 = shalt.err (!%p60_p4)
}
   0xa   :  { %20 = dma.hbm_to_vmem [thread:$0]  %s89_s1, 256, %s18_s10, [#allocation4]  }
   0xb   :  { %64 = dma.done.wait [#allocation4], 256  }
   0xc   :  { %65 = vsyncadd [#allocation4], 4294967040  ;;  %v24_v0 = vld [vmem:[#allocation3] sm:$0xff]  ;;  %v25_v1 = vld [vmem:[#allocation3 + $0x8] sm:$0xff]  ;;  %vm36_vm0 = vcmask 7168  }
   0xd   :  { %v26_v2 = vmax.f32 %v24_v0, 1e-06  ;;  %v27_v3 = vmax.f32 %v25_v1, 1e-06 }
   0xf   :  { %v28_v4 = vmul.f32 %v26_v2, %v26_v2  ;;  %v29_v5 = vmul.f32 %v27_v3, %v27_v3 }
  0x11   :  { %v30_v6 = vmul.f32 %v28_v4, %v26_v2  ;;  %v31_v7 = vmul.f32 %v29_v5, %v27_v3 }
  0x13   :  { %v32_v8 = vadd.f32 %v31_v7, %v30_v6 }
  0x15   :  { %33 = vadd.xlane.f32.xlu0 %v32_v8 }
  0x9e   :  { %v34_v9 = vpop.xlane.xlu0 %33 }
  0x9f   :  { %v35_v10 = vmul.f32 0.00390625, %v34_v9 }
  0xa1   :  { %37 = vst.msk [vmem:[%s90_s2] sm:$0xff] %vm36_vm0, %v35_v10 }
  0xa2   :  { %42 = vsyncpa [#allocation4], 1 }

</bundles_post_ra>
